<compile_context>
chip_gen: v7x
topology: tpu7x:2x2x1
jax: 0.10.0
libtpu: 0.0.40
codegen_flags: <defaults>
</compile_context>

<pallas_src>
import functools

import numpy as np

import jax
import jax.numpy as jnp
from jax import lax
from jax.experimental import pallas as pl
from jax.experimental.pallas import tpu as pltpu


def ca_layer_kernel(x_ref, m1_ref, m2_ref, const_ref, o_ref, *, H, W, C, nb):
    M, WC = x_ref.shape                         # (nb*H, W*C), lane-dense

    x_f32 = x_ref[...]                          # f32 copy for the residual
    x_bf = x_f32.astype(jnp.bfloat16)           # single cast for the MXU LHS

    # Row-within-image index -> boundary masks for the vertical taps.
    row = lax.broadcasted_iota(jnp.int32, (M, WC), 0) % H
    top = row == 0
    bot = row == H - 1

    # Packed constants (see prepare_kernel_params for the layout).
    b1 = const_ref[0:1, :]                      # (1, WC)  conv1 bias, tiled
    b2 = const_ref[1:2, :]                      # (1, WC)  conv2 bias, tiled
    wd1w = const_ref[2:2 + C, :]                # (C, WC)  1x1 #1, zero-padded
    bd1w = const_ref[2 + C:3 + C, :]            # (1, WC)
    wd2s = const_ref[3 + C:3 + 2 * C, :]        # (C, WC)  1x1 #2, group-tiled
    bd2s = const_ref[3 + 2 * C:4 + 2 * C, :]    # (1, WC)

    def conv3x3(lhs_bf16, m_ref, bias):
        # Three tap matmuls on the unshifted activation.  The vertical shift
        # is a sublane roll (XLU); the horizontal zero padding is baked into
        # the banded weight matrices.  f32 accumulation on the MXU.
        a0 = jnp.dot(lhs_bf16, m_ref[0], preferred_element_type=jnp.float32)
        a1 = jnp.dot(lhs_bf16, m_ref[1], preferred_element_type=jnp.float32)
        a2 = jnp.dot(lhs_bf16, m_ref[2], preferred_element_type=jnp.float32)
        dn = jnp.where(top, 0.0, pltpu.roll(a0, shift=1, axis=0))      # a0[h-1]
        up = jnp.where(bot, 0.0, pltpu.roll(a2, shift=M - 1, axis=0))  # a2[h+1]
        return a1 + dn + up + bias

    # process: Conv3x3 -> ReLU -> Conv3x3   (t1 stays in vregs)
    t1 = jnp.maximum(conv3x3(x_bf, m1_ref, b1), 0.0)
    y = conv3x3(t1.astype(jnp.bfloat16), m2_ref, b2)                   # (M, WC)

    inv_hw = 1.0 / float(H * W)
    for n in range(nb):                                   # static unrolled loop
        # AdaptiveAvgPool2d(1): sublane sum over H, then a circular
        # roll-and-add over the W lane groups of C channels.  After log2(W)
        # steps *every* lane w*C+c holds the channel-c total, so the result is
        # simultaneously the pooled value and its broadcast back to (1, WC).
        s = jnp.sum(y[n * H:(n + 1) * H, :], axis=0, keepdims=True)    # (1, WC)
        sh = C
        while sh < WC:
            s = s + pltpu.roll(s, shift=sh, axis=1)
            sh *= 2
        ya_flat = s * inv_hw                                           # (1, WC)
        y_avg = ya_flat[:, 0:C]                                        # (1, C)

        # conv_du: 1x1 -> ReLU -> 1x1 -> Sigmoid (zero-padded, exact).
        h = jnp.maximum(
            jnp.dot(y_avg, wd1w, preferred_element_type=jnp.float32) + bd1w,
            0.0)                                                       # (1, WC)
        z_flat = jax.nn.sigmoid(
            jnp.dot(h[:, 0:C], wd2s, preferred_element_type=jnp.float32)
            + bd2s)                                                    # (1, WC)

        # out = z * y_avg + x  (lane-dense residual epilogue)
        o_ref[n * H:(n + 1) * H, :] = (
            x_f32[n * H:(n + 1) * H, :] + z_flat * ya_flat
        ).astype(o_ref.dtype)


def prepare_kernel_params(params, H, W):
    """Precompute banded conv matrices + one packed lane-dense constants array."""
    w1, b1, w2, b2, wd1, bd1, wd2, bd2 = (np.asarray(p) for p in params)
    C = b1.shape[1]
    Cm = bd1.shape[1]
    WC = W * C

    def banded(w9):
        # w9: (9, Cin, Cout) with k = kh*3 + kw (HWIO flattened).
        # M_kh[wi*C+ci, w*C+co] = w9[kh*3+kw][ci, co] for wi = w + kw - 1.
        m = np.zeros((3, WC, WC), np.float32)
        for kh in range(3):
            for kw in range(3):
                for w in range(W):
                    wi = w + kw - 1
                    if 0 <= wi < W:
                        m[kh, wi * C:(wi + 1) * C, w * C:(w + 1) * C] = \
                            w9[kh * 3 + kw]
        return jnp.asarray(m, dtype=jnp.bfloat16)

    # Single packed constants array (2C+4, WC):
    #   row 0/1      : conv1 / conv2 biases tiled across the W lane groups
    #   rows 2..2+C  : wd1 (C, Cm) zero-padded to WC columns
    #   row 2+C      : bd1 zero-padded to WC
    #   rows 3+C..   : wd2 (Cm, C) zero-padded to (C, C) then tiled W times
    #   row 3+2C     : bd2 tiled across the W lane groups
    consts = np.zeros((2 * C + 4, WC), np.float32)
    consts[0, :] = np.tile(b1[0], W)
    consts[1, :] = np.tile(b2[0], W)
    consts[2:2 + C, 0:Cm] = wd1
    consts[2 + C, 0:Cm] = bd1[0]
    wd2_pad = np.zeros((C, C), np.float32)
    wd2_pad[0:Cm, :] = wd2
    consts[3 + C:3 + 2 * C, :] = np.tile(wd2_pad, (1, W))
    consts[3 + 2 * C, :] = np.tile(bd2[0], W)

    return banded(w1), banded(w2), jnp.asarray(consts)


def _vmem_limit_bytes():
    # v7x has only 64 MiB physical VMEM per TensorCore (v5e/v6e: 128 MiB);
    # leave headroom for compiler scratch and the double-buffered pipeline.
    try:
        cap = int(pltpu.get_tpu_info().vmem_capacity_bytes)
    except Exception:
        cap = 64 * 1024 * 1024
    return int(min(max(cap - 16 * 1024 * 1024, 32 * 1024 * 1024),
                   96 * 1024 * 1024))


def ca_layer_forward(x, kparams, *, images_per_step=1):
    """x: (N, H, W, C) NHWC.  images_per_step folds several images into one
    matmul M (useful on single-TC v5e/v6e); keep >=2 grid steps on v7x."""
    m1, m2, consts = kparams
    N, H, W, C = x.shape
    WC = W * C
    assert W & (W - 1) == 0, "in-kernel pooling assumes power-of-two W"
    nb = images_per_step
    assert N % nb == 0 and (nb * H) % 8 == 0
    M = nb * H

    # Wrapper-side reshape: pure layout plumbing; presents lane-dense blocks.
    x_flat = x.reshape(N * H, WC)

    kernel = functools.partial(ca_layer_kernel, H=H, W=W, C=C, nb=nb)

    def _const_spec(a):
        nd = a.ndim
        return pl.BlockSpec(a.shape, lambda b, _nd=nd: (0,) * _nd)

    flops = int(N * 2 * 3 * 2 * H * WC * WC)
    bytes_accessed = int(2 * N * H * WC * 4 + (m1.size + m2.size) * 2
                         + consts.size * 4)

    out_flat = pl.pallas_call(
        kernel,
        out_shape=jax.ShapeDtypeStruct((N * H, WC), x.dtype),
        grid_spec=pltpu.PrefetchScalarGridSpec(
            num_scalar_prefetch=0,
            grid=(N // nb,),
            in_specs=[
                pl.BlockSpec((M, WC), lambda b: (b, 0)),
                _const_spec(m1), _const_spec(m2), _const_spec(consts),
            ],
            out_specs=pl.BlockSpec((M, WC), lambda b: (b, 0)),
        ),
        compiler_params=pltpu.CompilerParams(
            dimension_semantics=("parallel",),
            vmem_limit_bytes=_vmem_limit_bytes()),
        cost_estimate=pl.CostEstimate(flops=flops,
                                      transcendentals=int(N * WC),
                                      bytes_accessed=bytes_accessed),
    )(x_flat, m1, m2, consts)
    return out_flat.reshape(N, H, W, C)


def init_params(key, channel, reduction):
    """Deterministic synthetic params.
    3x3 conv weights stored as (9, Cin, Cout) with k = kh*3 + kw (HWIO
    flattened); 1x1 conv weights as (Cin, Cout); biases as (1, Cout)."""
    C, Cm = channel, channel // reduction
    ks = jax.random.split(key, 8)
    s = 0.1
    w1 = jax.random.normal(ks[0], (9, C, C), jnp.float32) * s
    b1 = jax.random.normal(ks[1], (1, C), jnp.float32) * s
    w2 = jax.random.normal(ks[2], (9, C, C), jnp.float32) * s
    b2 = jax.random.normal(ks[3], (1, C), jnp.float32) * s
    wd1 = jax.random.normal(ks[4], (C, Cm), jnp.float32) * s
    bd1 = jax.random.normal(ks[5], (1, Cm), jnp.float32) * s
    wd2 = jax.random.normal(ks[6], (Cm, C), jnp.float32) * s
    bd2 = jax.random.normal(ks[7], (1, C), jnp.float32) * s
    return (w1, b1, w2, b2, wd1, bd1, wd2, bd2)


def ca_layer_reference(x, params):
    """Pure-JAX reference (NHWC) matching the PyTorch CALayer forward."""
    w1, b1, w2, b2, wd1, bd1, wd2, bd2 = params
    C = x.shape[-1]
    dn = ('NHWC', 'HWIO', 'NHWC')
    y = lax.conv_general_dilated(x, w1.reshape(3, 3, C, C), (1, 1), 'SAME',
                                 dimension_numbers=dn) + b1.reshape(1, 1, 1, C)
    y = jnp.maximum(y, 0.0)
    y = lax.conv_general_dilated(y, w2.reshape(3, 3, C, C), (1, 1), 'SAME',
                                 dimension_numbers=dn) + b2.reshape(1, 1, 1, C)
    ya = jnp.mean(y, axis=(1, 2), keepdims=True)               # (N,1,1,C)
    h = jnp.maximum(jnp.einsum('nijc,cd->nijd', ya, wd1)
                    + bd1.reshape(1, 1, 1, -1), 0.0)
    z = jax.nn.sigmoid(jnp.einsum('nijd,dc->nijc', h, wd2)
                       + bd2.reshape(1, 1, 1, C))
    return z * ya + x


if __name__ == "__main__":
    # CALayer(channels, 4) as used inside ConditionNet(channels=8).merge1
    channel, reduction = 8, 4
    N, H, W = 2, 16, 16

    key = jax.random.PRNGKey(0)
    kx, kp = jax.random.split(key)
    # NHWC input (equivalent PyTorch NCHW shape: (2, 8, 16, 16))
    x = jax.random.normal(kx, (N, H, W, channel), jnp.float32)
    params = init_params(kp, channel, reduction)
    kparams = prepare_kernel_params(params, H, W)

    out = jax.block_until_ready(ca_layer_forward(x, kparams))
    ref = jax.block_until_ready(ca_layer_reference(x, params))

    assert out.shape == (N, H, W, channel)
    # The convs run with bf16 MXU operands (f32 accumulation), so the
    # tolerance is set accordingly vs. the f32 reference.
    err = float(jnp.max(jnp.abs(out - ref)))
    assert jnp.allclose(out, ref, rtol=1e-2, atol=1e-2), err

    print("KERNEL_OK")
</pallas_src>

<mosaic_0001>
module attributes {stable_mosaic.version = 11 : i64} {
  func.func @ca_layer_kernel(%arg0: i32, %arg1: memref<16x128xf32, #tpu.memory_space<vmem>>, %arg2: memref<3x128x128xbf16, #tpu.memory_space<vmem>>, %arg3: memref<3x128x128xbf16, #tpu.memory_space<vmem>>, %arg4: memref<20x128xf32, #tpu.memory_space<vmem>>, %arg5: memref<16x128xf32, #tpu.memory_space<vmem>>) attributes {dimension_semantics = [#tpu.dimension_semantics<parallel>], iteration_bounds = array<i64: 2>, scalar_prefetch = 0 : i64, scratch_operands = 0 : i64, tpu.core_type = #tpu.core_type<tc>, window_params = [{transform_indices = @transform_0, window_bounds = array<i64: 16, 128>}, {pipeline_mode = #tpu.pipeline_mode<synchronous>, transform_indices = @transform_1, window_bounds = array<i64: 3, 128, 128>}, {pipeline_mode = #tpu.pipeline_mode<synchronous>, transform_indices = @transform_2, window_bounds = array<i64: 3, 128, 128>}, {pipeline_mode = #tpu.pipeline_mode<synchronous>, transform_indices = @transform_3, window_bounds = array<i64: 20, 128>}, {transform_indices = @transform_4, window_bounds = array<i64: 16, 128>}]} {
    %c0 = arith.constant 0 : index
    %c0_0 = arith.constant 0 : index
    %0 = vector.load %arg1[%c0, %c0_0] : memref<16x128xf32, #tpu.memory_space<vmem>>, vector<16x128xf32>
    %1 = arith.truncf %0 : vector<16x128xf32> to vector<16x128xbf16>
    %2 = tpu.iota {dimensions = array<i32: 0>} : vector<16x128xi32>
    %c16_i32 = arith.constant 16 : i32
    %c0_i32 = arith.constant 0 : i32
    %3 = arith.cmpi eq, %c16_i32, %c0_i32 : i32
    %c1_i32 = arith.constant 1 : i32
    %4 = arith.select %3, %c1_i32, %c16_i32 : i32
    %5 = vector.broadcast %4 : i32 to vector<16x128xi32>
    %6 = arith.remsi %2, %5 : vector<16x128xi32>
    %c0_i32_1 = arith.constant 0 : i32
    %7 = vector.broadcast %c0_i32_1 : i32 to vector<16x128xi32>
    %8 = arith.cmpi ne, %6, %7 : vector<16x128xi32>
    %c0_i32_2 = arith.constant 0 : i32
    %9 = vector.broadcast %c0_i32_2 : i32 to vector<16x128xi32>
    %10 = arith.cmpi slt, %6, %9 : vector<16x128xi32>
    %c0_i32_3 = arith.constant 0 : i32
    %11 = arith.cmpi slt, %4, %c0_i32_3 : i32
    %12 = vector.broadcast %11 : i1 to vector<16x128xi1>
    %13 = vector.broadcast %12 : vector<16x128xi1> to vector<16x128xi1>
    %14 = arith.xori %10, %13 : vector<16x128xi1>
    %15 = arith.andi %14, %8 : vector<16x128xi1>
    %16 = vector.broadcast %4 : i32 to vector<16x128xi32>
    %17 = arith.addi %6, %16 : vector<16x128xi32>
    %18 = arith.select %15, %17, %6 : vector<16x128xi1>, vector<16x128xi32>
    %c0_i32_4 = arith.constant 0 : i32
    %19 = vector.broadcast %c0_i32_4 : i32 to vector<16x128xi32>
    %20 = arith.cmpi eq, %18, %19 : vector<16x128xi32>
    %c15_i32 = arith.constant 15 : i32
    %21 = vector.broadcast %c15_i32 : i32 to vector<16x128xi32>
    %22 = arith.cmpi eq, %18, %21 : vector<16x128xi32>
    %c0_5 = arith.constant 0 : index
    %c0_6 = arith.constant 0 : index
    %23 = vector.load %arg4[%c0_5, %c0_6] : memref<20x128xf32, #tpu.memory_space<vmem>>, vector<1x128xf32>
    %c1 = arith.constant 1 : index
    %c0_7 = arith.constant 0 : index
    %24 = vector.load %arg4[%c1, %c0_7] : memref<20x128xf32, #tpu.memory_space<vmem>>, vector<1x128xf32>
    %c2 = arith.constant 2 : index
    %c0_8 = arith.constant 0 : index
    %25 = vector.load %arg4[%c2, %c0_8] : memref<20x128xf32, #tpu.memory_space<vmem>>, vector<8x128xf32>
    %c10 = arith.constant 10 : index
    %c0_9 = arith.constant 0 : index
    %26 = vector.load %arg4[%c10, %c0_9] : memref<20x128xf32, #tpu.memory_space<vmem>>, vector<1x128xf32>
    %c11 = arith.constant 11 : index
    %c0_10 = arith.constant 0 : index
    %27 = vector.load %arg4[%c11, %c0_10] : memref<20x128xf32, #tpu.memory_space<vmem>>, vector<8x128xf32>
    %c19 = arith.constant 19 : index
    %c0_11 = arith.constant 0 : index
    %28 = vector.load %arg4[%c19, %c0_11] : memref<20x128xf32, #tpu.memory_space<vmem>>, vector<1x128xf32>
    %c0_12 = arith.constant 0 : index
    %c0_13 = arith.constant 0 : index
    %c0_14 = arith.constant 0 : index
    %29 = vector.load %arg2[%c0_12, %c0_13, %c0_14] : memref<3x128x128xbf16, #tpu.memory_space<vmem>>, vector<1x128x128xbf16>
    %30 = vector.shape_cast %29 : vector<1x128x128xbf16> to vector<128x128xbf16>
    %cst = arith.constant dense<0.000000e+00> : vector<16x128xf32>
    %31 = tpu.matmul %1, %30, %cst {dimension_numbers = #tpu.dot_dimension_numbers<[1], [0], [0], [1], [0, 0, 1, 1], [], []>} : vector<16x128xbf16>, vector<128x128xbf16>, vector<16x128xf32> -> vector<16x128xf32>
    %c1_15 = arith.constant 1 : index
    %c0_16 = arith.constant 0 : index
    %c0_17 = arith.constant 0 : index
    %32 = vector.load %arg2[%c1_15, %c0_16, %c0_17] : memref<3x128x128xbf16, #tpu.memory_space<vmem>>, vector<1x128x128xbf16>
    %33 = vector.shape_cast %32 : vector<1x128x128xbf16> to vector<128x128xbf16>
    %cst_18 = arith.constant dense<0.000000e+00> : vector<16x128xf32>
    %34 = tpu.matmul %1, %33, %cst_18 {dimension_numbers = #tpu.dot_dimension_numbers<[1], [0], [0], [1], [0, 0, 1, 1], [], []>} : vector<16x128xbf16>, vector<128x128xbf16>, vector<16x128xf32> -> vector<16x128xf32>
    %c2_19 = arith.constant 2 : index
    %c0_20 = arith.constant 0 : index
    %c0_21 = arith.constant 0 : index
    %35 = vector.load %arg2[%c2_19, %c0_20, %c0_21] : memref<3x128x128xbf16, #tpu.memory_space<vmem>>, vector<1x128x128xbf16>
    %36 = vector.shape_cast %35 : vector<1x128x128xbf16> to vector<128x128xbf16>
    %cst_22 = arith.constant dense<0.000000e+00> : vector<16x128xf32>
    %37 = tpu.matmul %1, %36, %cst_22 {dimension_numbers = #tpu.dot_dimension_numbers<[1], [0], [0], [1], [0, 0, 1, 1], [], []>} : vector<16x128xbf16>, vector<128x128xbf16>, vector<16x128xf32> -> vector<16x128xf32>
    %c1_i32_23 = arith.constant 1 : i32
    %38 = tpu.dynamic_rotate %31 by %c1_i32_23 dim 0 : vector<16x128xf32>, i32 -> vector<16x128xf32>
    %cst_24 = arith.constant 0.000000e+00 : f32
    %39 = vector.broadcast %cst_24 : f32 to vector<16x128xf32>
    %40 = arith.select %20, %39, %38 : vector<16x128xi1>, vector<16x128xf32>
    %c15_i32_25 = arith.constant 15 : i32
    %41 = tpu.dynamic_rotate %37 by %c15_i32_25 dim 0 : vector<16x128xf32>, i32 -> vector<16x128xf32>
    %cst_26 = arith.constant 0.000000e+00 : f32
    %42 = vector.broadcast %cst_26 : f32 to vector<16x128xf32>
    %43 = arith.select %22, %42, %41 : vector<16x128xi1>, vector<16x128xf32>
    %44 = arith.addf %34, %40 : vector<16x128xf32>
    %45 = arith.addf %44, %43 : vector<16x128xf32>
    %46 = vector.broadcast %23 : vector<1x128xf32> to vector<16x128xf32>
    %47 = arith.addf %45, %46 : vector<16x128xf32>
    %cst_27 = arith.constant 0.000000e+00 : f32
    %48 = vector.broadcast %cst_27 : f32 to vector<16x128xf32>
    %49 = arith.maximumf %47, %48 : vector<16x128xf32>
    %50 = arith.truncf %49 : vector<16x128xf32> to vector<16x128xbf16>
    %c0_28 = arith.constant 0 : index
    %c0_29 = arith.constant 0 : index
    %c0_30 = arith.constant 0 : index
    %51 = vector.load %arg3[%c0_28, %c0_29, %c0_30] : memref<3x128x128xbf16, #tpu.memory_space<vmem>>, vector<1x128x128xbf16>
    %52 = vector.shape_cast %51 : vector<1x128x128xbf16> to vector<128x128xbf16>
    %cst_31 = arith.constant dense<0.000000e+00> : vector<16x128xf32>
    %53 = tpu.matmul %50, %52, %cst_31 {dimension_numbers = #tpu.dot_dimension_numbers<[1], [0], [0], [1], [0, 0, 1, 1], [], []>} : vector<16x128xbf16>, vector<128x128xbf16>, vector<16x128xf32> -> vector<16x128xf32>
    %c1_32 = arith.constant 1 : index
    %c0_33 = arith.constant 0 : index
    %c0_34 = arith.constant 0 : index
    %54 = vector.load %arg3[%c1_32, %c0_33, %c0_34] : memref<3x128x128xbf16, #tpu.memory_space<vmem>>, vector<1x128x128xbf16>
    %55 = vector.shape_cast %54 : vector<1x128x128xbf16> to vector<128x128xbf16>
    %cst_35 = arith.constant dense<0.000000e+00> : vector<16x128xf32>
    %56 = tpu.matmul %50, %55, %cst_35 {dimension_numbers = #tpu.dot_dimension_numbers<[1], [0], [0], [1], [0, 0, 1, 1], [], []>} : vector<16x128xbf16>, vector<128x128xbf16>, vector<16x128xf32> -> vector<16x128xf32>
    %c2_36 = arith.constant 2 : index
    %c0_37 = arith.constant 0 : index
    %c0_38 = arith.constant 0 : index
    %57 = vector.load %arg3[%c2_36, %c0_37, %c0_38] : memref<3x128x128xbf16, #tpu.memory_space<vmem>>, vector<1x128x128xbf16>
    %58 = vector.shape_cast %57 : vector<1x128x128xbf16> to vector<128x128xbf16>
    %cst_39 = arith.constant dense<0.000000e+00> : vector<16x128xf32>
    %59 = tpu.matmul %50, %58, %cst_39 {dimension_numbers = #tpu.dot_dimension_numbers<[1], [0], [0], [1], [0, 0, 1, 1], [], []>} : vector<16x128xbf16>, vector<128x128xbf16>, vector<16x128xf32> -> vector<16x128xf32>
    %c1_i32_40 = arith.constant 1 : i32
    %60 = tpu.dynamic_rotate %53 by %c1_i32_40 dim 0 : vector<16x128xf32>, i32 -> vector<16x128xf32>
    %cst_41 = arith.constant 0.000000e+00 : f32
    %61 = vector.broadcast %cst_41 : f32 to vector<16x128xf32>
    %62 = arith.select %20, %61, %60 : vector<16x128xi1>, vector<16x128xf32>
    %c15_i32_42 = arith.constant 15 : i32
    %63 = tpu.dynamic_rotate %59 by %c15_i32_42 dim 0 : vector<16x128xf32>, i32 -> vector<16x128xf32>
    %cst_43 = arith.constant 0.000000e+00 : f32
    %64 = vector.broadcast %cst_43 : f32 to vector<16x128xf32>
    %65 = arith.select %22, %64, %63 : vector<16x128xi1>, vector<16x128xf32>
    %66 = arith.addf %56, %62 : vector<16x128xf32>
    %67 = arith.addf %66, %65 : vector<16x128xf32>
    %68 = vector.broadcast %24 : vector<1x128xf32> to vector<16x128xf32>
    %69 = arith.addf %67, %68 : vector<16x128xf32>
    %cst_44 = arith.constant dense<0.000000e+00> : vector<128xf32>
    %70 = vector.multi_reduction <add>, %69, %cst_44 [0] : vector<16x128xf32> to vector<128xf32>
    %71 = vector.shape_cast %70 : vector<128xf32> to vector<1x128xf32>
    %c8_i32 = arith.constant 8 : i32
    %72 = tpu.dynamic_rotate %71 by %c8_i32 dim 1 : vector<1x128xf32>, i32 -> vector<1x128xf32>
    %73 = arith.addf %71, %72 : vector<1x128xf32>
    %c16_i32_45 = arith.constant 16 : i32
    %74 = tpu.dynamic_rotate %73 by %c16_i32_45 dim 1 : vector<1x128xf32>, i32 -> vector<1x128xf32>
    %75 = arith.addf %73, %74 : vector<1x128xf32>
    %c32_i32 = arith.constant 32 : i32
    %76 = tpu.dynamic_rotate %75 by %c32_i32 dim 1 : vector<1x128xf32>, i32 -> vector<1x128xf32>
    %77 = arith.addf %75, %76 : vector<1x128xf32>
    %c64_i32 = arith.constant 64 : i32
    %78 = tpu.dynamic_rotate %77 by %c64_i32 dim 1 : vector<1x128xf32>, i32 -> vector<1x128xf32>
    %79 = arith.addf %77, %78 : vector<1x128xf32>
    %cst_46 = arith.constant 3.906250e-03 : f32
    %80 = vector.broadcast %cst_46 : f32 to vector<1x128xf32>
    %81 = arith.mulf %79, %80 : vector<1x128xf32>
    %82 = vector.extract_strided_slice %81 {offsets = [0, 0], sizes = [1, 8], strides = [1, 1]} : vector<1x128xf32> to vector<1x8xf32>
    %cst_47 = arith.constant dense<0.000000e+00> : vector<1x128xf32>
    %83 = tpu.matmul %82, %25, %cst_47 {dimension_numbers = #tpu.dot_dimension_numbers<[1], [0], [0], [1], [0, 0, 1, 1], [], []>} : vector<1x8xf32>, vector<8x128xf32>, vector<1x128xf32> -> vector<1x128xf32>
    %84 = arith.addf %83, %26 : vector<1x128xf32>
    %cst_48 = arith.constant 0.000000e+00 : f32
    %85 = vector.broadcast %cst_48 : f32 to vector<1x128xf32>
    %86 = arith.maximumf %84, %85 : vector<1x128xf32>
    %87 = vector.extract_strided_slice %86 {offsets = [0, 0], sizes = [1, 8], strides = [1, 1]} : vector<1x128xf32> to vector<1x8xf32>
    %cst_49 = arith.constant dense<0.000000e+00> : vector<1x128xf32>
    %88 = tpu.matmul %87, %27, %cst_49 {dimension_numbers = #tpu.dot_dimension_numbers<[1], [0], [0], [1], [0, 0, 1, 1], [], []>} : vector<1x8xf32>, vector<8x128xf32>, vector<1x128xf32> -> vector<1x128xf32>
    %89 = arith.addf %88, %28 : vector<1x128xf32>
    %90 = arith.negf %89 : vector<1x128xf32>
    %91 = math.exp %90 : vector<1x128xf32>
    %cst_50 = arith.constant 1.000000e+00 : f32
    %92 = vector.broadcast %cst_50 : f32 to vector<1x128xf32>
    %93 = arith.addf %92, %91 : vector<1x128xf32>
    %94 = arith.divf %92, %93 : vector<1x128xf32>
    %95 = arith.mulf %94, %81 : vector<1x128xf32>
    %96 = vector.broadcast %95 : vector<1x128xf32> to vector<16x128xf32>
    %97 = arith.addf %0, %96 : vector<16x128xf32>
    %c0_51 = arith.constant 0 : index
    %c0_52 = arith.constant 0 : index
    %98 = vector.load %arg5[%c0_51, %c0_52] : memref<16x128xf32, #tpu.memory_space<vmem>>, vector<16x128xf32>
    tpu.vector_store %arg5[%c0_51, %c0_52], %97 {strides = array<i32>} : memref<16x128xf32, #tpu.memory_space<vmem>>, vector<16x128xf32>,
    return
  }
  func.func @transform_0(%arg0: i32) -> (i32, i32) {
    %c0_i32 = arith.constant 0 : i32
    %c0_i32_0 = arith.constant 0 : i32
    return %arg0, %c0_i32 : i32, i32
  }
  func.func @transform_1(%arg0: i32) -> (i32, i32, i32) {
    %c0_i32 = arith.constant 0 : i32
    %c0_i32_0 = arith.constant 0 : i32
    %c0_i32_1 = arith.constant 0 : i32
    %c0_i32_2 = arith.constant 0 : i32
    return %c0_i32, %c0_i32_0, %c0_i32_1 : i32, i32, i32
  }
  func.func @transform_2(%arg0: i32) -> (i32, i32, i32) {
    %c0_i32 = arith.constant 0 : i32
    %c0_i32_0 = arith.constant 0 : i32
    %c0_i32_1 = arith.constant 0 : i32
    %c0_i32_2 = arith.constant 0 : i32
    return %c0_i32, %c0_i32_0, %c0_i32_1 : i32, i32, i32
  }
  func.func @transform_3(%arg0: i32) -> (i32, i32) {
    %c0_i32 = arith.constant 0 : i32
    %c0_i32_0 = arith.constant 0 : i32
    %c0_i32_1 = arith.constant 0 : i32
    return %c0_i32, %c0_i32_0 : i32, i32
  }
  func.func @transform_4(%arg0: i32) -> (i32, i32) {
    %c0_i32 = arith.constant 0 : i32
    %c0_i32_0 = arith.constant 0 : i32
    return %arg0, %c0_i32 : i32, i32
  }
}

</mosaic_0001>

<bundles_post_ra>
// kernel: tpu_custom_call.1
= control target key start
LH: loop header
LB: loop body
LE: loop exit
PB: predicated region body
PF: predicated region fallthrough
CT: control target
= control target key end

     0   :  { %9 = vsyncpa [#allocation3], 0  ;;  %s2303_s0 = inlined_call_operand.hbm [shape: f32[32,128], index: 0, kind: input, shape index: {}]   ;;  %s2304_s1 = inlined_call_operand.hbm [shape: bf16[3,128,128], index: 1, kind: input, shape index: {}]   ;;  %s2305_s2 = inlined_call_operand.hbm [shape: bf16[3,128,128], index: 2, kind: input, shape index: {}]   ;;  %s2306_s3 = inlined_call_operand.hbm [shape: f32[20,128], index: 3, kind: input, shape index: {}]   ;;  %s2307_s4 = inlined_call_operand.hbm [shape: f32[32,128], index: 4, kind: output, shape index: {}]  }
   0x1   :  { %11 = vsyncpa [#allocation3 + $0x1], 0 }
   0x2   :  { %12 = vsyncpa [#allocation6], 0 }
   0x3   :  { %13 = vsyncpa [#allocation9], 0 }
   0x4   :  { %14 = vsyncpa [#allocation4], 0 }
   0x5   :  { %16 = vsyncpa [#allocation4 + $0x1], 0  ;;  %s1915_s15 = smov 0   ;;  %s1917_s16 = smov 0  }
   0x6   :  { %s1919_s17 = smov 0   ;;  %s1921_s18 = smov 0  }
   0x7 LB: > { %s1936_s19 = sadd.s32 4294967295, %s1872_s18   ;;  %s1281_s20 = sadd.s32 4294967294, %s1872_s18   ;;  %s1872_s18 = sphi %s1921_s18, %s2334_s18   ;;  %s1868_s17 = sphi %s1919_s17, %s2333_s17   ;;  %s1864_s16 = sphi %s1917_s16, %s2332_s16   ;;  %s1860_s15 = sphi %s1915_s15, %s2331_s15  }
   0x8   : > { %p42_p0 = scmp.ne.s32.totalorder %s1864_s16, %s1860_s15  ;;  %p2308_p1 = scmp.eq.s32.totalorder %s1936_s19, 0 }
   0x9   : > { %p135_p3 = scmp.eq.s32.totalorder %s1281_s20, 1  ;;  %p1282_p5 = scmp.ge.s32.totalorder %s1872_s18, 1 }
   0xa   : > { %p1945_p4 = por %p2308_p1, %p42_p0  ;;  %p142_p7 = scmp.lt.s32.totalorder %s1872_s18, 3 }
   0xb   : > { %p1950_p6 = por %p135_p3, %p42_p0  ;;  %s1874_s24 = smov [#allocation5]  }
   0xc   : > { %s2311_s21 = scalar_select %p1945_p4, 1, 0 }
   0xd   : > { %s2312_s22 = scalar_select %p1950_p6, 1, 0 }
   0xe   : > { %p1955_p8 = pnand %p1282_p5, %p142_p7  ;;  %s154_s25 = sshll.u32 %s1874_s24, 4  ;;  %s1959_s25 = int_to_ptr.vmem [resolvable:$true] %s154_s25 }
   0xf   : > { %s1875_s27 = smov [#allocation7]   ;;  %s1876_s29 = smov [#allocation8]  }
  0x10   : > { %s2313_s23 = scalar_select %p1955_p8, 1, 0 }
  0x11   : > { %p1560_p9 = pneg %p1955_p8  ;;  %s167_s28 = sshll.u32 %s1875_s27, 4  ;;  %s1970_s28 = int_to_ptr.vmem [resolvable:$true] %s167_s28 }
  0x12   : > { %s1972_s30 = sshll.u32 %s1876_s29, 4  ;;  %s1684_s7 = scalar_lea.hbm %s2304_s1, 3072  ;;  %s181_s30 = int_to_ptr.vmem [resolvable:$true] %s1972_s30 }
  0x13   : > { %p1966_p11 = pnand %p1560_p9, %p2308_p1  ;;  %p1685_p12 = scmp.ne.s32.totalorder %s2304_s1, %s1684_s7 }
  0x14   : > { %p1691_p5 = scmp.lt.u32.totalorder %s1684_s7, %s2304_s1 }
  0x15   : > { %p1982_p13 = pneg %p1966_p11 }
  0x17   : > { %p1687_p0 = pnand %p1982_p13, %p1685_p12 }
  0x19   : > { %p1688_p3 = pneg %p1687_p0 }
  0x1b   : > { %p1693_p7 = pnand %p1691_p5, %p1688_p3 }
  0x1d   : > { %1696 = shalt.err (!%p1693_p7)
}
  0x1e   : > { %s1697_s13 = scalar_lea.vmem %s1959_s25, 3072  ;;  %p1705_p2 = scmp.lt.s32.totalorder %s1959_s25, %s1959_s25 }
  0x1f   : > { %p1698_p9 = scmp.ne.s32.totalorder %s1959_s25, %s1697_s13  ;;  %p1706_p6 = scmp.lt.s32.totalorder %s1697_s13, %s1697_s13 }
  0x21   : > { %p1700_p10 = pnand %p1698_p9, %p1982_p13  ;;  %p1707_p12 = por %p1706_p6, %p1705_p2 }
  0x23   : > { %p1701_p1 = pneg %p1700_p10 }
  0x25   : > { %p1708_p0 = pnand %p1707_p12, %p1701_p1 }
  0x27   : > { %1711 = shalt.err (!%p1708_p0)
}
  0x28   : > { %s1877_s14 = smov 64   ;;  %s1878_s20 = smov 4  }
  0x29   : > { %1563 = dma.hbm_to_vmem [thread:$0]  (!%p1966_p11), %s2304_s1, 3072, %s1959_s25, [#allocation6], %s1877_s14, %s1877_s14, %s1878_s20  }
  0x2a   : > { %s1712_s6 = scalar_lea.hbm %s2305_s2, 3072 }
  0x2b   : > { %p1713_p2 = scmp.ne.s32.totalorder %s2305_s2, %s1712_s6  ;;  %p1719_p10 = scmp.lt.u32.totalorder %s1712_s6, %s2305_s2 }
  0x2d   : > { %p1715_p1 = pnand %p1713_p2, %p1982_p13 }
  0x2f   : > { %p1716_p6 = pneg %p1715_p1 }
  0x31   : > { %p1721_p3 = pnand %p1719_p10, %p1716_p6 }
  0x33   : > { %1724 = shalt.err (!%p1721_p3)
}
  0x34   : > { %s1725_s25 = scalar_lea.vmem %s1970_s28, 3072  ;;  %p1733_p12 = scmp.lt.s32.totalorder %s1970_s28, %s1970_s28 }
  0x35   : > { %p1726_p5 = scmp.ne.s32.totalorder %s1970_s28, %s1725_s25  ;;  %p1734_p0 = scmp.lt.s32.totalorder %s1725_s25, %s1725_s25 }
  0x37   : > { %p1728_p7 = pnand %p1726_p5, %p1982_p13  ;;  %p1735_p2 = por %p1734_p0, %p1733_p12 }
  0x39   : > { %p1729_p9 = pneg %p1728_p7 }
  0x3b   : > { %p1736_p1 = pnand %p1735_p2, %p1729_p9 }
  0x3d   : > { %1739 = shalt.err (!%p1736_p1)
}
  0x3e   : > { %1566 = dma.hbm_to_vmem [thread:$0]  (!%p1966_p11), %s2305_s2, 3072, %s1970_s28, [#allocation6], %s1877_s14, %s1877_s14, %s1878_s20  }
  0x3f   : > { %s1740_s29 = scalar_lea.hbm %s2306_s3, 384 }
  0x40   : > { %p1741_p6 = scmp.ne.s32.totalorder %s2306_s3, %s1740_s29  ;;  %p1747_p5 = scmp.lt.u32.totalorder %s1740_s29, %s2306_s3 }
  0x42   : > { %p1743_p10 = pnand %p1741_p6, %p1982_p13 }
  0x44   : > { %p1744_p3 = pneg %p1743_p10 }
  0x46   : > { %p1749_p7 = pnand %p1747_p5, %p1744_p3 }
  0x48   : > { %1752 = shalt.err (!%p1749_p7)
}
  0x49   : > { %s1753_s9 = scalar_lea.vmem %s181_s30, 384  ;;  %p1761_p2 = scmp.lt.s32.totalorder %s181_s30, %s181_s30 }
  0x4a   : > { %p1754_p9 = scmp.ne.s32.totalorder %s181_s30, %s1753_s9  ;;  %p1762_p1 = scmp.lt.s32.totalorder %s1753_s9, %s1753_s9 }
  0x4c   : > { %p1756_p12 = pnand %p1754_p9, %p1982_p13  ;;  %p1763_p4 = por %p1762_p1, %p1761_p2 }
  0x4e   : > { %p1757_p0 = pneg %p1756_p12 }
  0x50   : > { %p1764_p8 = pnand %p1763_p4, %p1757_p0 }
  0x52   : > { %1767 = shalt.err (!%p1764_p8)
}
  0x53   : > { %s1879_s28 = smov 128   ;;  %s1880_s10 = smov 8  }
  0x54   : > { %1569 = dma.hbm_to_vmem [thread:$0]  (!%p1966_p11), %s2306_s3, 384, %s181_s30, [#allocation9], %s1879_s28, %s1879_s28, %s1880_s10  }
  0x55   : > { %s2049_s11 = sadd.s32 1, %s1872_s18   ;;  %s29_s12 = sadd.s32 1, %s1868_s17 }
  0x56   : > { %s26_s25 = ssub.s32 %s1872_s18, %s2049_s11  ;;  %p36_p8 = scmp.ne.s32.totalorder %s1868_s17, %s1864_s16 }
  0x57   : > { %p27_p4 = scmp.eq.s32.totalorder %s26_s25, 0  ;;  %p37_p13 = scmp.eq.s32.totalorder %s1872_s18, 0 }
  0x58   : > { %p1581_p6 = scmp.lt.s32.totalorder %s1872_s18, 2  ;;  %p2316_p3 = scmp.eq.s32.totalorder %s1936_s19, 1 }
  0x59   : > { %s2059_s13 = scalar_select %p27_p4, %s1868_s17, %s29_s12  }
  0x5a   : > { %p38_p10 = por %p37_p13, %p36_p8  ;;  %p2063_p5 = por %p2316_p3, %p36_p8 }
  0x5b   : > { %s194_s24 = sand.u32 1, %s1868_s17   ;;  %s1354_s27 = sshll.u32 %s1872_s18, 8 }
  0x5c   : > { %s1287_s30 = sshll.u32 %s194_s24, 4  ;;  %s2072_s6 = scalar_lea.hbm %s2303_s0, %s1354_s27 }
  0x5d   : > { %s198_s7 = scalar_lea.vmem [#allocation2], %s1287_s30  ;;  %p2074_p11 = pnand %p1581_p6, %p38_p10 }
  0x5e   : > { %s205_s8 = sshll.u32 %s198_s7, 4  ;;  %s2080_s14 = scalar_lea.sflag [#allocation3], %s194_s24  ;;  %s2078_s8 = int_to_ptr.vmem [resolvable:$true] %s205_s8 }
  0x5f   : > { %s1768_s20 = scalar_lea.hbm %s2072_s6, 256  ;;  %p1770_p9 = pneg %p2074_p11 }
  0x60   : > { %p1769_p7 = scmp.ne.s32.totalorder %s2072_s6, %s1768_s20  ;;  %s1773_s27 = scalar_lea.hbm %s2303_s0, 512 }
  0x61   : > { %p1774_p2 = scmp.lt.u32.totalorder %s2072_s6, %s2303_s0  ;;  %p1775_p1 = scmp.lt.u32.totalorder %s1773_s27, %s1768_s20 }
  0x62   : > { %p1771_p12 = pnand %p1770_p9, %p1769_p7  ;;  %p1777_p8 = scmp.lt.u32.totalorder %s1768_s20, %s2072_s6 }
  0x63   : > { %p1776_p4 = por %p1775_p1, %p1774_p2 }
  0x64   : > { %p1772_p0 = pneg %p1771_p12 }
  0x65   : > { %p1778_p13 = por %p1777_p8, %p1776_p4 }
  0x67   : > { %p1779_p6 = pnand %p1778_p13, %p1772_p0 }
  0x69   : > { %1782 = shalt.err (!%p1779_p6)
}
  0x6a   : > { %s1783_s24 = scalar_lea.vmem %s2078_s8, 256  ;;  %s1881_s5 = smov [#allocation2]  }
  0x6b   : > { %p1784_p10 = scmp.ne.s32.totalorder %s2078_s8, %s1783_s24  ;;  %s1788_s7 = sshll.u32 %s1881_s5, 4  ;;  %s1789_s7 = int_to_ptr.vmem [resolvable:$false] %s1788_s7 }
  0x6c   : > { %s1790_s25 = scalar_lea.vmem %s1789_s7, 512  ;;  %p1791_p12 = scmp.lt.s32.totalorder %s2078_s8, %s1789_s7 }
  0x6d   : > { %p1786_p3 = pnand %p1784_p10, %p1770_p9  ;;  %p1792_p2 = scmp.lt.s32.totalorder %s1790_s25, %s1783_s24 }
  0x6f   : > { %p1787_p7 = pneg %p1786_p3  ;;  %p1793_p1 = por %p1792_p2, %p1791_p12 }
  0x71   : > { %p1794_p4 = pnand %p1793_p1, %p1787_p7 }
  0x73   : > { %1797 = shalt.err (!%p1794_p4)
}
  0x74   : > { %1573 = dma.hbm_to_vmem [thread:$0]  (!%p2074_p11), %s2072_s6, 256, %s2078_s8, %s2080_s14, %s1879_s28, %s1879_s28, %s1880_s10  }
  0x75   : > { %p2319_p9 = scmp.ne.s32.totalorder %s2313_s23, 0 }
  0x76   : > { %s2114_s20 = sand.u32 (!%p2319_p9), 1, %s1864_s16   ;;  %p2320_p0 = scmp.ne.s32.totalorder (!%p2319_p9), %s2311_s21, 0 }
  0x77   : > { %217 = sbr.rel (%p2319_p9) target bundleno = 1637 (0x665), region = 36  ;;  %s1291_s12 = sshll.u32 (!%p2319_p9), %s2114_s20, 4 }
  0x78   : > { %s220_s27 = scalar_lea.sflag (!%p2319_p9), [#allocation3], %s2114_s20  ;;  %s2120_s9 = scalar_lea.vmem (!%p2319_p9), [#allocation2], %s1291_s12 }
  0x7e   : > { %1843 = dma.done.wait (%p2320_p0), %s220_s27, 256  }
  0x7f   : > { %1845 = vsyncadd (%p2320_p0), %s220_s27, 4294967040  ;;  %p2321_p11 = scmp.eq.s32.totalorder %s1936_s19, 0 }
  0x81   : > { %1847 = dma.done.wait (%p2321_p11), [#allocation6], 6144   ;;  %p2322_p8 = pmov %p2321_p11 }
  0x83   : > { %1849 = vsyncadd (%p2322_p8), [#allocation6], 4294961152  ;;  %p2323_p13 = pmov %p2322_p8 }
  0x84   : > { %p2324_p6 = pmov %p2322_p8 }
  0x85   : > { %1851 = dma.done.wait (%p2323_p13), [#allocation9], 384  }
  0x86   : > { %1853 = vsyncadd (%p2324_p6), [#allocation9], 4294966912  ;;  %v1882_v0 = vmov 0.0   ;;  %vm1883_vm0 = vmmov 0   ;;  %v1632_v1 = vld [vmem:[#allocation5] sm:$0xff]   ;;  %v1633_v2 = vld [vmem:[#allocation5 + $0x8] sm:$0xff]   ;;  %v266_v44 = vlaneseq }
  0x87   : > { %1414 = vmatprep.subr.bf16.mxu0 %v1882_v0  ;;  %1434 = vmatprep.subr.bf16.mxu1 %v1882_v0  ;;  %v1634_v3 = vld [vmem:[#allocation5 + $0x10] sm:$0xff]   ;;  %v1639_v4 = vld [vmem:[#allocation5 + $0x80] sm:$0xff]   ;;  %v1635_v5 = vld [vmem:[#allocation5 + $0x18] sm:$0xff]   ;;  %s1884_s21 = smov 8   ;;  %s1885_s23 = smov 16   ;;  %vm1002_vm5 = vcmask 64512  }
  0x88   : > { %1430 = vmatprep.mubr.msk.bf16.mxu0 %vm1883_vm0, %v1882_v0  ;;  %1450 = vmatprep.mubr.msk.bf16.mxu1 %vm1883_vm0, %v1882_v0  ;;  %v1641_v6 = vld [vmem:[#allocation5 + $0x88] sm:$0xff]   ;;  %v1643_v7 = vld [vmem:[#allocation5 + $0x90] sm:$0xff]   ;;  %v1636_v8 = vld [vmem:[#allocation5 + $0x20] sm:$0xff]   ;;  %v2194_v45 = vshrl.u32 %v266_v44, 7  ;;  %s1886_s28 = smov 32   ;;  %s1887_s10 = smov 64  }
  0x89   : > { %1415 = vmatpush3.bf16.msra.mxu0 %v1632_v1  ;;  %1435 = vmatpush3.bf16.msra.mxu1 %v1639_v4  ;;  %v1645_v9 = vld [vmem:[#allocation5 + $0x98] sm:$0xff]   ;;  %v1637_v10 = vld [vmem:[#allocation5 + $0x28] sm:$0xff]   ;;  %v1647_v11 = vld [vmem:[#allocation5 + $0xa0] sm:$0xff]   ;;  %s1355_s6 = sshll.u32 %s1936_s19, 8  ;;  %s259_s8 = scalar_lea.vmem [#allocation10], %s1291_s12 }
  0x8a   : > { %1416 = vmatprep.subr.bf16.mxu0 %v1882_v0  ;;  %1436 = vmatprep.subr.bf16.mxu1 %v1882_v0  ;;  %v1638_v12 = vld [vmem:[#allocation5 + $0x30] sm:$0xff]   ;;  %v1640_v13 = vld [vmem:[#allocation5 + $0x38] sm:$0xff]   ;;  %v1649_v16 = vld [vmem:[#allocation5 + $0xa8] sm:$0xff]   ;;  %vm533_vm1 = vcmp.lt.s32.totalorder %v2194_v45, 1  ;;  %vm540_vm2 = vcmp.lt.s32.totalorder %v2194_v45, 7  ;;  %v273_v62 = vand.u32 15, %v2194_v45  ;;  %s2254_s24 = scalar_lea.hbm %s2307_s4, %s1355_s6 }
  0x8b   : > { %v2151_v14 = vld [vmem:[%s2120_s9] sm:$0xff]  ;;  %v2154_v15 = vld [vmem:[%s2120_s9 + $0x8] sm:$0xff]  ;;  %v268_v63 = vadd.s32 8, %v2194_v45  ;;  %s1179_s14 = sshll.u32 %s259_s8, 4  ;;  %s1166_s19 = scalar_lea.sflag [#allocation4], %s2114_s20  ;;  %s2258_s14 = int_to_ptr.vmem [resolvable:$true] %s1179_s14 }
  0x8c   : > { %v1651_v17 = vld [vmem:[#allocation5 + $0xb0] sm:$0xff]   ;;  %v1642_v18 = vld [vmem:[#allocation5 + $0x40] sm:$0xff]   ;;  %v265_v19 = vpack.c.bf16 %v2154_v15, %v2151_v14  ;;  %v1653_v20 = vld [vmem:[#allocation5 + $0xb8] sm:$0xff]   ;;  %vm2208_vm3 = vcmp.eq.s32.totalorder %v273_v62, 0  ;;  %s1798_s5 = scalar_lea.vmem %s2258_s14, 256  ;;  %s1888_s7 = smov [#allocation10]  }
  0x8d   : > { %1417 = vmatpush3.bf16.msra.mxu0 %v1633_v2  ;;  %1437 = vmatpush3.bf16.msra.mxu1 %v1641_v6  ;;  %v1644_v21 = vld [vmem:[#allocation5 + $0x48] sm:$0xff]   ;;  %v1646_v22 = vld [vmem:[#allocation5 + $0x50] sm:$0xff]   ;;  %v1648_v23 = vld [vmem:[#allocation5 + $0x58] sm:$0xff]   ;;  %v280_v2 = vand.u32 15, %v268_v63  ;;  %p1799_p10 = scmp.ne.s32.totalorder %s2258_s14, %s1798_s5  ;;  %s1802_s25 = sshll.u32 %s1888_s7, 4  ;;  %s1803_s25 = int_to_ptr.vmem [resolvable:$false] %s1802_s25 }
  0x8e   : > { %1418 = vmatprep.subr.bf16.mxu0 %v1882_v0  ;;  %1438 = vmatprep.subr.bf16.mxu1 %v1882_v0  ;;  %v1650_v24 = vld [vmem:[#allocation5 + $0x60] sm:$0xff]   ;;  %v1652_v25 = vld [vmem:[#allocation5 + $0x68] sm:$0xff]   ;;  %v1654_v26 = vld [vmem:[#allocation5 + $0x70] sm:$0xff]   ;;  %s1804_s12 = scalar_lea.vmem %s1803_s25, 512  ;;  %p1805_p12 = scmp.lt.s32.totalorder %s2258_s14, %s1803_s25 }
  0x8f   : > { %v1655_v27 = vld [vmem:[#allocation5 + $0x78] sm:$0xff]   ;;  %v1656_v28 = vld [vmem:[#allocation7] sm:$0xff]   ;;  %v1658_v30 = vld [vmem:[#allocation7 + $0x8] sm:$0xff]   ;;  %vm2214_vm4 = vcmp.eq.s32.totalorder %v280_v2, 15  ;;  %p1800_p3 = pnand %p1799_p10, %p2063_p5  ;;  %p1806_p2 = scmp.lt.s32.totalorder %s1804_s12, %s1798_s5 }
  0x90   : > { %v1657_v29 = vld [vmem:[#allocation7 + $0x80] sm:$0xff]   ;;  %v1659_v31 = vld [vmem:[#allocation7 + $0x88] sm:$0xff]   ;;  %v1660_v32 = vld [vmem:[#allocation7 + $0x10] sm:$0xff]  }
  0x91   : > { %1419 = vmatpush3.bf16.msra.mxu0 %v1634_v3  ;;  %1439 = vmatpush3.bf16.msra.mxu1 %v1643_v7  ;;  %v1661_v33 = vld [vmem:[#allocation7 + $0x90] sm:$0xff]   ;;  %v1662_v34 = vld [vmem:[#allocation7 + $0x18] sm:$0xff]   ;;  %v1664_v36 = vld [vmem:[#allocation7 + $0x20] sm:$0xff]   ;;  %p1801_p7 = pneg %p1800_p3  ;;  %p1807_p1 = por %p1806_p2, %p1805_p12 }
  0x92   : > { %1420 = vmatprep.subr.bf16.mxu0 %v1882_v0  ;;  %1440 = vmatprep.subr.bf16.mxu1 %v1882_v0  ;;  %v1663_v35 = vld [vmem:[#allocation7 + $0x98] sm:$0xff]   ;;  %v1665_v37 = vld [vmem:[#allocation7 + $0xa0] sm:$0xff]   ;;  %v1666_v38 = vld [vmem:[#allocation7 + $0x28] sm:$0xff]  }
  0x93   : > { %v1667_v39 = vld [vmem:[#allocation7 + $0xa8] sm:$0xff]   ;;  %v1668_v40 = vld [vmem:[#allocation7 + $0x30] sm:$0xff]   ;;  %v1670_v42 = vld [vmem:[#allocation7 + $0x38] sm:$0xff]   ;;  %p1808_p4 = pnand %p1807_p1, %p1801_p7 }
  0x94   : > { %v1669_v41 = vld [vmem:[#allocation7 + $0xb0] sm:$0xff]   ;;  %v1671_v43 = vld [vmem:[#allocation7 + $0xb8] sm:$0xff]  }
  0x95   : > { %1421 = vmatpush3.bf16.msra.mxu0 %v1635_v5  ;;  %1441 = vmatpush3.bf16.msra.mxu1 %v1645_v9 }
  0x96   : > { %1422 = vmatprep.subr.bf16.mxu0 %v1882_v0  ;;  %1442 = vmatprep.subr.bf16.mxu1 %v1882_v0 }
  0x99   : > { %1423 = vmatpush3.bf16.msra.mxu0 %v1636_v8  ;;  %1443 = vmatpush3.bf16.msra.mxu1 %v1647_v11  ;;  %v1320_v8 = vld [vmem:[#allocation8] ss:$0 sm:$0xff] }
  0x9a   : > { %1424 = vmatprep.subr.bf16.mxu0 %v1882_v0  ;;  %1444 = vmatprep.subr.bf16.mxu1 %v1882_v0 }
  0x9d   : > { %1425 = vmatpush3.bf16.msra.mxu0 %v1637_v10  ;;  %1445 = vmatpush3.bf16.msra.mxu1 %v1649_v16 }
  0x9e   : > { %1426 = vmatprep.subr.bf16.mxu0 %v1882_v0  ;;  %1446 = vmatprep.subr.bf16.mxu1 %v1882_v0 }
  0xa1   : > { %1427 = vmatpush3.bf16.msra.mxu0 %v1638_v12  ;;  %1447 = vmatpush3.bf16.msra.mxu1 %v1651_v17 }
  0xa2   : > { %1428 = vmatprep.subr.bf16.mxu0 %v1882_v0  ;;  %1448 = vmatprep.subr.bf16.mxu1 %v1882_v0 }
  0xa5   : > { %1429 = vmatpush3.bf16.msra.mxu0 %v1640_v13  ;;  %1449 = vmatpush3.bf16.msra.mxu1 %v1653_v20 }
  0xa6   : > { %1454 = vmatprep.subr.bf16.mxu0 %v1882_v0  ;;  %1474 = vmatprep.subr.bf16.mxu1 %v1882_v0 }
  0xa8   : > { %1431 = vmatmul.mubr.bf16.vlgmr.msra.gmra.mrb[0].mxu0 %v265_v19  ;;  %1451 = vmatmul.mubr.bf16.vlgmr.msra.gmra.mrb[0].mxu1 %v265_v19 }
  0xa9   : > { %1455 = vmatpush3.bf16.msra.mxu0 %v1642_v18  ;;  %1470 = vmatprep.mubr.msk.bf16.mxu0 %vm1883_vm0, %v1882_v0 }
  0xaa   : > { %1456 = vmatprep.subr.bf16.mxu0 %v1882_v0  ;;  %1490 = vmatprep.mubr.msk.bf16.mxu1 %vm1883_vm0, %v1882_v0 }
  0xab   : > { %1475 = vmatpush3.bf16.msra.mxu1 %v1656_v28  ;;  %v1678_v28 = vld [vmem:[#allocation7 + $0x70] sm:$0xff]  }
  0xac   : > { %1476 = vmatprep.subr.bf16.mxu1 %v1882_v0 }
  0xad   : > { %1457 = vmatpush3.bf16.msra.mxu0 %v1644_v21  ;;  %v1672_v21 = vld [vmem:[#allocation7 + $0x40] sm:$0xff]  }
  0xae   : > { %1458 = vmatprep.subr.bf16.mxu0 %v1882_v0 }
  0xaf   : > { %1477 = vmatpush3.bf16.msra.mxu1 %v1658_v30 }
  0xb0   : > { %1478 = vmatprep.subr.bf16.mxu1 %v1882_v0 }
  0xb1   : > { %1459 = vmatpush3.bf16.msra.mxu0 %v1646_v22 }
  0xb2   : > { %1460 = vmatprep.subr.bf16.mxu0 %v1882_v0 }
  0xb3   : > { %1479 = vmatpush3.bf16.msra.mxu1 %v1660_v32 }
  0xb4   : > { %1480 = vmatprep.subr.bf16.mxu1 %v1882_v0 }
  0xb5   : > { %1461 = vmatpush3.bf16.msra.mxu0 %v1648_v23  ;;  %v1673_v23 = vld [vmem:[#allocation7 + $0x48] sm:$0xff]  }
  0xb6   : > { %1462 = vmatprep.subr.bf16.mxu0 %v1882_v0 }
  0xb7   : > { %1481 = vmatpush3.bf16.msra.mxu1 %v1662_v34 }
  0xb8   : > { %1482 = vmatprep.subr.bf16.mxu1 %v1882_v0 }
  0xb9   : > { %1463 = vmatpush3.bf16.msra.mxu0 %v1650_v24  ;;  %v1674_v24 = vld [vmem:[#allocation7 + $0x50] sm:$0xff]  }
  0xba   : > { %1464 = vmatprep.subr.bf16.mxu0 %v1882_v0 }
  0xbb   : > { %1483 = vmatpush3.bf16.msra.mxu1 %v1664_v36 }
  0xbc   : > { %1484 = vmatprep.subr.bf16.mxu1 %v1882_v0 }
  0xbd   : > { %1465 = vmatpush3.bf16.msra.mxu0 %v1652_v25  ;;  %v1675_v25 = vld [vmem:[#allocation7 + $0x58] sm:$0xff]  }
  0xbe   : > { %1466 = vmatprep.subr.bf16.mxu0 %v1882_v0 }
  0xbf   : > { %1485 = vmatpush3.bf16.msra.mxu1 %v1666_v38 }
  0xc0   : > { %1486 = vmatprep.subr.bf16.mxu1 %v1882_v0 }
  0xc1   : > { %1467 = vmatpush3.bf16.msra.mxu0 %v1654_v26  ;;  %v1676_v26 = vld [vmem:[#allocation7 + $0x60] sm:$0xff]  }
  0xc2   : > { %1468 = vmatprep.subr.bf16.mxu0 %v1882_v0 }
  0xc3   : > { %1487 = vmatpush3.bf16.msra.mxu1 %v1668_v40 }
  0xc4   : > { %1488 = vmatprep.subr.bf16.mxu1 %v1882_v0 }
  0xc5   : > { %1469 = vmatpush3.bf16.msra.mxu0 %v1655_v27  ;;  %v1677_v27 = vld [vmem:[#allocation7 + $0x68] sm:$0xff]  }
  0xc6   : > { %1494 = vmatprep.subr.bf16.mxu0 %v1882_v0 }
  0xc7   : > { %1489 = vmatpush3.bf16.msra.mxu1 %v1670_v42 }
  0xc8   : > { %1471 = vmatmul.mubr.bf16.vlgmr.msra.gmra.mrb[4].mxu0 %v265_v19  ;;  %1514 = vmatprep.subr.bf16.mxu1 %v1882_v0 }
  0xc9   : > { %1510 = vmatprep.mubr.msk.bf16.mxu0 %vm1883_vm0, %v1882_v0  ;;  %1495 = vmatpush3.bf16.msra.mxu0 %v1657_v29  ;;  %v1679_v29 = vld [vmem:[#allocation7 + $0x78] sm:$0xff]  }
  0xca   : > { %1496 = vmatprep.subr.bf16.mxu0 %v1882_v0 }
  0xcd   : > { %1497 = vmatpush3.bf16.msra.mxu0 %v1659_v31 }
  0xce   : > { %1498 = vmatprep.subr.bf16.mxu0 %v1882_v0 }
  0xd1   : > { %1499 = vmatpush3.bf16.msra.mxu0 %v1661_v33 }
  0xd2   : > { %1500 = vmatprep.subr.bf16.mxu0 %v1882_v0 }
  0xd5   : > { %1501 = vmatpush3.bf16.msra.mxu0 %v1663_v35 }
  0xd6   : > { %1502 = vmatprep.subr.bf16.mxu0 %v1882_v0 }
  0xd9   : > { %1503 = vmatpush3.bf16.msra.mxu0 %v1665_v37 }
  0xda   : > { %1504 = vmatprep.subr.bf16.mxu0 %v1882_v0 }
  0xdd   : > { %1505 = vmatpush3.bf16.msra.mxu0 %v1667_v39 }
  0xde   : > { %1506 = vmatprep.subr.bf16.mxu0 %v1882_v0 }
  0xe1   : > { %1507 = vmatpush3.bf16.msra.mxu0 %v1669_v41 }
  0xe2   : > { %1508 = vmatprep.subr.bf16.mxu0 %v1882_v0 }
  0xe5   : > { %1509 = vmatpush3.bf16.msra.mxu0 %v1671_v43 }
  0xe6   : > { %1534 = vmatprep.subr.mxu0 %v1882_v0 }
 0x17b   : > { %v401_v46 = vpop.f32.mrb[0].mxu0  ;;  %v524_v54 = vpop.f32.mrb[0].mxu1 }
 0x17c   : > { %v531_v47 = vrot.slane %v401_v46, 7  ;;  %v1432_v48 = vpop.f32.mrb[1].mxu0  ;;  %v538_v55 = vrot.slane %v524_v54, 1  ;;  %v1452_v56 = vpop.f32.mrb[1].mxu1  ;;  %v1345_v54 = vld [vmem:[#allocation8 + $0x1] ss:$0 sm:$0xff] }
 0x17d   : > { %v404_v49 = vpop.f32.mrb[2].mxu0  ;;  %v527_v57 = vpop.f32.mrb[2].mxu1 }
 0x17e   : > { %v532_v50 = vrot.slane %v404_v49, 7  ;;  %v1433_v51 = vpop.f32.mrb[3].mxu0  ;;  %v539_v58 = vrot.slane %v527_v57, 1  ;;  %v1453_v59 = vpop.f32.mrb[3].mxu1 }
 0x180   : > { %v535_v52 = vsel %vm533_vm1, %v532_v50, %v531_v47  ;;  %v534_v53 = vsel %vm533_vm1, %v531_v47, %v532_v50  ;;  %v541_v60 = vsel %vm540_vm2, %v538_v55, %v539_v58  ;;  %v542_v61 = vsel %vm540_vm2, %v539_v58, %v538_v55 }
 0x181   : > { %v536_v3 = vsel %vm2208_vm3, 0.0, %v535_v52  ;;  %v544_v13 = vsel %vm2214_vm4, 0.0, %v542_v61 }
 0x19b   : > { %v627_v4 = vpop.f32.mrb[4].mxu0 }
 0x19c   : > { %v628_v5 = vadd.f32 %v627_v4, %v536_v3  ;;  %v1472_v6 = vpop.f32.mrb[5].mxu0 }
 0x19d   : > { %v630_v9 = vpop.f32.mrb[6].mxu0 }
 0x19e   : > { %v634_v10 = vadd.f32 %v628_v5, %v541_v60  ;;  %v631_v11 = vadd.f32 %v630_v9, %v534_v53  ;;  %v1473_v12 = vpop.f32.mrb[7].mxu0  ;;  %v299_v5 = vld [vmem:[#allocation8 + $0x2] sm:$0xff] }
 0x1a0   : > { %v640_v16 = vadd.f32 %v1320_v8, %v634_v10  ;;  %v635_v17 = vadd.f32 %v631_v11, %v544_v13 }
 0x1a2   : > { %v641_v18 = vadd.f32 %v1320_v8, %v635_v17  ;;  %v642_v19 = vmax.f32 %v640_v16, 0.0  ;;  %v301_v8 = vld [vmem:[#allocation8 + $0xb] sm:$0xff]  ;;  %v300_v16 = vld [vmem:[#allocation8 + $0xa] sm:$0x1] }
 0x1a4   : > { %v643_v20 = vmax.f32 %v641_v18, 0.0 }
 0x1a6   : > { %v644_v22 = vpack.c.bf16 %v643_v20, %v642_v19 }
 0x1a8   : > { %1491 = vmatmul.mubr.bf16.vlgmr.msra.gmra.mrb[4].mxu1 %v644_v22  ;;  %1511 = vmatmul.mubr.bf16.vlgmr.msra.gmra.mrb[8].mxu0 %v644_v22 }
 0x1a9   : > { %1515 = vmatpush3.bf16.msra.mxu1 %v1672_v21  ;;  %1530 = vmatprep.mubr.msk.bf16.mxu1 %vm1883_vm0, %v1882_v0  ;;  %v302_v21 = vld [vmem:[#allocation8 + $0x13] sm:$0x1] }
 0x1aa   : > { %1516 = vmatprep.subr.bf16.mxu1 %v1882_v0  ;;  %1536 = vmatprep.mubr.msk.f32.mxu0 %vm1883_vm0, %v1882_v0 }
 0x1ab   : > { %1535 = vmatpush3.msra.mxu0 %v299_v5 }
 0x1ad   : > { %1517 = vmatpush3.bf16.msra.mxu1 %v1673_v23 }
 0x1ae   : > { %1518 = vmatprep.subr.bf16.mxu1 %v1882_v0 }
 0x1b1   : > { %1519 = vmatpush3.bf16.msra.mxu1 %v1674_v24 }
 0x1b2   : > { %1520 = vmatprep.subr.bf16.mxu1 %v1882_v0 }
 0x1b5   : > { %1521 = vmatpush3.bf16.msra.mxu1 %v1675_v25 }
 0x1b6   : > { %1522 = vmatprep.subr.bf16.mxu1 %v1882_v0 }
 0x1b9   : > { %1523 = vmatpush3.bf16.msra.mxu1 %v1676_v26 }
 0x1ba   : > { %1524 = vmatprep.subr.bf16.mxu1 %v1882_v0 }
 0x1bd   : > { %1525 = vmatpush3.bf16.msra.mxu1 %v1677_v27 }
 0x1be   : > { %1526 = vmatprep.subr.bf16.mxu1 %v1882_v0 }
 0x1c1   : > { %1527 = vmatpush3.bf16.msra.mxu1 %v1678_v28  ;;  %v1159_v28 = vsub.s32 0, %v2194_v45 }
 0x1c2   : > { %1528 = vmatprep.subr.bf16.mxu1 %v1882_v0 }
 0x1c5   : > { %1529 = vmatpush3.bf16.msra.mxu1 %v1679_v29 }
 0x1c6   : > { %1539 = vmatprep.subr.mxu1 %v1882_v0 }
 0x1c8   : > { %1531 = vmatmul.mubr.bf16.vlgmr.msra.gmra.mrb[8].mxu1 %v644_v22 }
 0x1c9   : > { %1541 = vmatprep.mubr.msk.f32.mxu1 %vm1883_vm0, %v1882_v0  ;;  %1540 = vmatpush3.msra.mxu1 %v301_v8 }
 0x27b   : > { %v743_v30 = vpop.f32.mrb[4].mxu1  ;;  %v866_v31 = vpop.f32.mrb[8].mxu0 }
 0x27c   : > { %v1492_v32 = vpop.f32.mrb[5].mxu1  ;;  %v1512_v33 = vpop.f32.mrb[9].mxu0  ;;  %v873_v36 = vrot.slane %v743_v30, 7  ;;  %v879_v37 = vrot.slane %v866_v31, 1 }
 0x27d   : > { %v746_v34 = vpop.f32.mrb[6].mxu1  ;;  %v869_v35 = vpop.f32.mrb[10].mxu0 }
 0x27e   : > { %v874_v38 = vrot.slane %v746_v34, 7  ;;  %v880_v39 = vrot.slane %v869_v35, 1  ;;  %v1493_v40 = vpop.f32.mrb[7].mxu1  ;;  %v1513_v41 = vpop.f32.mrb[11].mxu0 }
 0x280   : > { %v876_v42 = vsel %vm533_vm1, %v874_v38, %v873_v36  ;;  %v881_v43 = vsel %vm540_vm2, %v879_v37, %v880_v39  ;;  %v875_v0 = vsel %vm533_vm1, %v873_v36, %v874_v38  ;;  %v882_v44 = vsel %vm540_vm2, %v880_v39, %v879_v37 }
 0x281   : > { %v877_v46 = vsel %vm2208_vm3, 0.0, %v876_v42  ;;  %v884_v55 = vsel %vm2214_vm4, 0.0, %v882_v44 }
 0x29b   : > { %v967_v47 = vpop.f32.mrb[8].mxu1 }
 0x29c   : > { %v968_v48 = vadd.f32 %v967_v47, %v877_v46  ;;  %v1532_v49 = vpop.f32.mrb[9].mxu1 }
 0x29d   : > { %v970_v50 = vpop.f32.mrb[10].mxu1 }
 0x29e   : > { %v974_v51 = vadd.f32 %v968_v48, %v881_v43  ;;  %v971_v52 = vadd.f32 %v970_v50, %v875_v0  ;;  %v1533_v53 = vpop.f32.mrb[11].mxu1 }
 0x2a0   : > { %v975_v56 = vadd.f32 %v971_v52, %v884_v55  ;;  %v980_v57 = vadd.f32 %v1345_v54, %v974_v51 }
 0x2a2   : > { %v981_v58 = vadd.f32 %v1345_v54, %v975_v56 }
 0x2a4   : > { %v982_v59 = vadd.f32 %v981_v58, %v980_v57 }
 0x2a6   : > { %v983_v60 = vrot.slane %v982_v59, 4 }
 0x2a8   : > { %v984_v61 = vadd.f32 %v983_v60, %v982_v59 }
 0x2aa   : > { %v985_v62 = vrot.slane %v984_v61, 2 }
 0x2ac   : > { %v986_v63 = vadd.f32 %v985_v62, %v984_v61 }
 0x2ae   : > { %v987_v1 = vrot.slane %v986_v63, 1 }
 0x2b0   : > { %v988_v2 = vadd.f32 %v987_v1, %v986_v63 }
 0x2b2   : > { %989 = vrot.lane.b32.xlu0 %v988_v2, %s1884_s21 }
 0x324   : > { %v990_v3 = vpop.permute.xlu0 %989 }
 0x325   : > { %v991_v4 = vadd.f32 %v990_v3, %v988_v2 }
 0x327   : > { %992 = vrot.lane.b32.xlu0 %v991_v4, %s1885_s23 }
 0x399   : > { %v993_v6 = vpop.permute.xlu0 %992 }
 0x39a   : > { %v994_v7 = vadd.f32 %v993_v6, %v991_v4 }
 0x39c   : > { %995 = vrot.lane.b32.xlu1 %v994_v7, %s1886_s28 }
 0x40e   : > { %v996_v9 = vpop.permute.xlu1 %995 }
 0x40f   : > { %v997_v10 = vadd.f32 %v996_v9, %v994_v7 }
 0x411   : > { %998 = vrot.lane.b32.xlu1 %v997_v10, %s1887_s10 }
 0x483   : > { %v999_v11 = vpop.permute.xlu1 %998 }
 0x484   : > { %v1000_v12 = vadd.f32 %v999_v11, %v997_v10 }
 0x486   : > { %v1001_v13 = vmul.f32 0.00390625, %v1000_v12 }
 0x488   : > { %1537 = vmatmul.mubr.msk.f32.vlgmr.msra.gmra.mrb[12].mxu0 %vm1002_vm5, %v1001_v13 }
 0x55b   : > { %v1072_v17 = vpop.f32.mrb[12].mxu0 }
 0x55c   : > { %v1073_v18 = vadd.f32 %v1072_v17, %v300_v16  ;;  %v1538_v19 = vpop.f32.mrb[13].mxu0 }
 0x55e   : > { %v1076_v20 = vmax.f32 %v1073_v18, 0.0 }
 0x560   : > { %1542 = vmatmul.mubr.msk.f32.vlgmr.msra.gmra.mrb[12].mxu1 %vm1002_vm5, %v1076_v20 }
 0x633   : > { %v1146_v22 = vpop.f32.mrb[12].mxu1 }
 0x634   : > { %v1147_v23 = vadd.f32 %v1146_v22, %v302_v21  ;;  %v1543_v24 = vpop.f32.mrb[13].mxu1 }
 0x636   : > { %v1348_v25 = vmul.f32 -1.442695, %v1147_v23 }
 0x638   : > { %1680 = vpow2.f32 %v1348_v25 }
 0x642   : > { %v1681_v26 = vpop.eup %1680 }
 0x643   : > { %v1153_v27 = vadd.f32 1.0, %v1681_v26 }
 0x645   : > { %1682 = vrcp.f32 %v1153_v27 }
 0x64f   : > { %v1683_v29 = vpop.eup %1682 }
 0x650   : > { %v1156_v30 = vmul.f32 %v1683_v29, %v1001_v13 }
 0x652   : > { %v1160_v31 = vrot.slane %v1156_v30, %v1159_v28 }
 0x654   : > { %v1161_v32 = vadd.f32 %v1160_v31, %v2151_v14  ;;  %v1162_v33 = vadd.f32 %v1160_v31, %v2154_v15 }
 0x656   : > { %1163 = vst [vmem:[%s259_s8] sm:$0xff] %v1161_v32  ;;  %1164 = vst [vmem:[%s259_s8 + $0x8] sm:$0xff] %v1162_v33 }
 0x657   : > { %1811 = shalt.err (!%p1808_p4)
}
 0x658   : > { %s1812_s27 = scalar_lea.hbm %s2254_s24, 256  ;;  %s1816_s28 = scalar_lea.hbm %s2307_s4, 512 }
 0x659   : > { %p1813_p9 = scmp.ne.s32.totalorder %s2254_s24, %s1812_s27  ;;  %p1817_p8 = scmp.lt.u32.totalorder %s2254_s24, %s2307_s4 }
 0x65a   : > { %p1818_p13 = scmp.lt.u32.totalorder %s1816_s28, %s1812_s27  ;;  %p1820_p10 = scmp.lt.u32.totalorder %s1812_s27, %s2254_s24 }
 0x65b   : > { %p1814_p0 = pnand %p1813_p9, %p2063_p5 }
 0x65c   : > { %p1819_p6 = por %p1818_p13, %p1817_p8 }
 0x65d   : > { %p1815_p11 = pneg %p1814_p0 }
 0x65e   : > { %p1821_p3 = por %p1820_p10, %p1819_p6 }
 0x660   : > { %p1822_p7 = pnand %p1821_p3, %p1815_p11 }
 0x662   : > { %1825 = shalt.err (!%p1822_p7)
}
 0x663   : > { %s1889_s8 = smov 128  }
 0x664   : > { %1558 = dma.vmem_to_hbm [thread:$0]  (%p2063_p5), %s2258_s14, 256, %s2254_s24, %s1166_s19, %s1889_s8, %s1889_s8, %s1884_s21  }
 0x665 PF: > { %s1194_s30 = sand.u32 1, %s1860_s15   ;;  %p2329_p12 = scmp.ne.s32.totalorder %s2312_s22, 0 }
 0x666   : > { %p2330_p2 = scmp.ge.s32.totalorder %s1872_s18, 2  ;;  %s1195_s29 = scalar_lea.sflag [#allocation4], %s1194_s30 }
 0x668   : > { %p1575_p1 = pnand %p2330_p2, %p2329_p12 }
 0x66a   : > { %1855 = dma.done.wait (!%p1575_p1), %s1195_s29, 256  }
 0x66b   : > { %1857 = vsyncadd (!%p1575_p1), %s1195_s29, 4294967040  ;;  %p19_p4 = scmp.ge.s32.totalorder %s2049_s11, 4   ;;  %s2331_s15 = smov %s1864_s16 }
 0x66c   : > { %s2332_s16 = smov %s1868_s17  ;;  %s2333_s17 = smov %s2059_s13 }
 0x66d   : > { %s2334_s18 = smov %s2049_s11  ;;  %21 = sbr.rel (!%p19_p4) target bundleno = 7 (0x7), region = 97 }
 0x674   :  { %1200 = vsyncpa [#allocation3], 1 }
 0x675   :  { %1202 = vsyncpa [#allocation3 + $0x1], 1 }
 0x676   :  { %1203 = vsyncpa [#allocation6], 1 }
 0x677   :  { %1204 = vsyncpa [#allocation9], 1 }
 0x678   :  { %1205 = vsyncpa [#allocation4], 1 }
 0x679   :  { %1207 = vsyncpa [#allocation4 + $0x1], 1 }

</bundles_post_ra>
